<compile_context>
chip_gen: v6e
topology: v6e:2x2x1
jax: 0.10.0
libtpu: 0.0.40
codegen_flags: <defaults>
</compile_context>

<pallas_src>
import functools

import jax
import jax.numpy as jnp
from jax.experimental import pallas as pl
from jax.experimental.pallas import tpu as pltpu

_LANE = 128
_MIB = 1024 * 1024


def _sublane_multiple(dtype) -> int:
    """Sublane tile height for a dtype: 8 (4-byte), 16 (2-byte), 32 (1-byte)."""
    itemsize = max(1, jnp.dtype(dtype).itemsize)
    return 8 * max(1, 4 // itemsize)


@functools.lru_cache(maxsize=None)
def _tpu_budget():
    """Generation-aware knobs: (per-operand block bytes, vmem_limit_bytes, dual_tc)."""
    vmem = None
    try:
        info = pltpu.get_tpu_info()
        for attr in ("vmem_capacity_bytes", "vmem_size_bytes", "vmem_bytes"):
            v = getattr(info, attr, None)
            if v:
                vmem = int(v)
                break
    except Exception:
        vmem = None

    if vmem is not None and vmem > 96 * _MIB:
        # v5e / v6e: 128 MiB VMEM, single TensorCore per chip -> big blocks, no split need.
        return 8 * _MIB, 64 * _MIB, False
    # v7x (64 MiB VMEM per TC, 2 TCs/chip) or unknown: conservative blocks, keep both
    # TensorCores fed with >= 2 grid steps.
    return 4 * _MIB, 32 * _MIB, True


def _mean_sub_kernel(x_ref, o_ref):
    # x_ref / o_ref: (nb, C, hw_tile) VMEM tiles.  Reduce over the channel (sublane) axis
    # in f32, subtract, cast the result once back to the output dtype.
    x = x_ref[...].astype(jnp.float32)
    m = jnp.mean(x, axis=1, keepdims=True)
    o_ref[...] = (x - m).astype(o_ref.dtype)


def _my_bn_1_impl(x: jax.Array, *, donate_input: bool) -> jax.Array:
    """Pallas equivalent of: x - torch.mean(x, dim=1, keepdim=True)."""
    N, C, H, W = x.shape
    hw = H * W
    itemsize = jnp.dtype(x.dtype).itemsize
    sub = _sublane_multiple(x.dtype)
    c_pad = pl.cdiv(C, sub) * sub                  # sublane-padded channel rows in VMEM
    hw_lanes = pl.cdiv(hw, _LANE) * _LANE          # lane-padded spatial extent in VMEM

    max_block_bytes, vmem_limit, dual_tc = _tpu_budget()

    # --- choose spatial tile -------------------------------------------------------
    if c_pad * hw_lanes * itemsize <= max_block_bytes:
        # Whole spatial axis in one block: full-extent last dim (no 128-divisibility
        # requirement), one contiguous DMA chunk per (n, c) row, zero padding traffic.
        hw_tile = hw
    else:
        budget_lanes = (max_block_bytes // (c_pad * itemsize)) // _LANE * _LANE
        hw_tile = max(_LANE, budget_lanes)
        # Large-C corner: keep contiguous per-row chunks >= ~2 KiB (512 f32 lanes) by
        # letting the block grow modestly past the nominal budget.
        floor = min(hw_lanes, 4 * _LANE)
        if hw_tile < floor and c_pad * floor * itemsize <= (3 * max_block_bytes) // 2:
            hw_tile = floor
        # TODO(synk): for extremely wide C (c_pad * 512 lanes >> budget) split C onto a
        # third 'arbitrary' grid axis with an f32 VMEM accumulator instead of tiny tiles.

    hw_tile_lanes = pl.cdiv(hw_tile, _LANE) * _LANE      # true VMEM footprint of the tile
    block_bytes = c_pad * hw_tile_lanes * itemsize

    # --- pack batch elements per step when the per-sample block is small ------------
    nb = 1
    for cand in range(N, 0, -1):
        if N % cand == 0 and cand * block_bytes <= max_block_bytes:
            nb = cand
            break

    num_hw_tiles = pl.cdiv(hw, hw_tile)

    # --- on dual-TC chips keep >= 2 grid steps so both TensorCores get work ---------
    if dual_tc and (N // nb) * num_hw_tiles < 2:
        if nb > 1:
            for cand in range(N // 2, 0, -1):
                if N % cand == 0:
                    nb = cand
                    break
        elif hw > _LANE:
            hw_tile = max(_LANE, pl.cdiv(pl.cdiv(hw, 2), _LANE) * _LANE)
            num_hw_tiles = pl.cdiv(hw, hw_tile)

    grid = (N // nb, num_hw_tiles)

    x3 = x.reshape(N, C, hw)

    flops = 2 * N * C * hw                        # per-position channel sum + subtract
    bytes_accessed = 2 * N * C * hw * itemsize    # exactly one read + one write

    out3 = pl.pallas_call(
        _mean_sub_kernel,
        out_shape=jax.ShapeDtypeStruct((N, C, hw), x.dtype),
        grid_spec=pltpu.PrefetchScalarGridSpec(
            num_scalar_prefetch=0,
            grid=grid,
            in_specs=[pl.BlockSpec((nb, C, hw_tile), lambda i, j: (i, 0, j))],
            out_specs=pl.BlockSpec((nb, C, hw_tile), lambda i, j: (i, 0, j)),
        ),
        compiler_params=pltpu.CompilerParams(
            # No reduction across grid axes -> both parallel (megacore / dual-TC shard).
            dimension_semantics=("parallel", "parallel"),
            vmem_limit_bytes=vmem_limit,
        ),
        cost_estimate=pl.CostEstimate(
            flops=flops, transcendentals=0, bytes_accessed=bytes_accessed
        ),
        # Alias input->output only when the caller actually donates the input buffer;
        # otherwise XLA would insert a defensive copy.
        input_output_aliases=({0: 0} if donate_input else {}),
    )(x3)

    return out3.reshape(N, C, H, W)


# Public entry points.  `my_bn_1` keeps the input alive; `my_bn_1_inplace` donates the
# input at the jit boundary so the pallas-level alias genuinely reuses the HBM buffer.
my_bn_1 = jax.jit(functools.partial(_my_bn_1_impl, donate_input=False))
my_bn_1_inplace = jax.jit(
    functools.partial(_my_bn_1_impl, donate_input=True), donate_argnums=(0,)
)


if __name__ == "__main__":
    key = jax.random.PRNGKey(0)

    # Shape implied by the module: NCHW activations.
    x = jax.random.normal(key, (2, 4, 16, 16), dtype=jnp.float32)
    out = my_bn_1(x)
    jax.block_until_ready(out)
    ref = x - jnp.mean(x, axis=1, keepdims=True)
    assert out.shape == x.shape
    assert jnp.allclose(out, ref, atol=1e-5, rtol=1e-5)

    # Non-128-multiple spatial size (14x14 = 196): full-extent block, no pad/slice.
    x2 = jax.random.normal(jax.random.PRNGKey(1), (2, 4, 14, 14), dtype=jnp.float32)
    out2 = my_bn_1(x2)
    jax.block_until_ready(out2)
    ref2 = x2 - jnp.mean(x2, axis=1, keepdims=True)
    assert jnp.allclose(out2, ref2, atol=1e-5, rtol=1e-5)

    # Donating (in-place) entry point: input buffer is consumed, result unchanged.
    x3 = jax.random.normal(jax.random.PRNGKey(2), (2, 4, 16, 16), dtype=jnp.float32)
    ref3 = x3 - jnp.mean(x3, axis=1, keepdims=True)
    out3 = my_bn_1_inplace(x3)
    jax.block_until_ready(out3)
    assert jnp.allclose(out3, ref3, atol=1e-5, rtol=1e-5)

    print("KERNEL_OK")
</pallas_src>

<mosaic_0001>
module attributes {stable_mosaic.version = 11 : i64} {
  func.func @_mean_sub_kernel(%arg0: i32, %arg1: i32, %arg2: memref<1x4x256xf32, #tpu.memory_space<vmem>>, %arg3: memref<1x4x256xf32, #tpu.memory_space<vmem>>) attributes {dimension_semantics = [#tpu.dimension_semantics<parallel>, #tpu.dimension_semantics<parallel>], iteration_bounds = array<i64: 2, 1>, scalar_prefetch = 0 : i64, scratch_operands = 0 : i64, tpu.core_type = #tpu.core_type<tc>, window_params = [{transform_indices = @transform_0, window_bounds = array<i64: 1, 4, 256>}, {transform_indices = @transform_1, window_bounds = array<i64: 1, 4, 256>}]} {
    %c0 = arith.constant 0 : index
    %c0_0 = arith.constant 0 : index
    %c0_1 = arith.constant 0 : index
    %0 = vector.load %arg2[%c0, %c0_0, %c0_1] : memref<1x4x256xf32, #tpu.memory_space<vmem>>, vector<1x4x256xf32>
    %cst = arith.constant dense<0.000000e+00> : vector<1x256xf32>
    %1 = vector.multi_reduction <add>, %0, %cst [1] : vector<1x4x256xf32> to vector<1x256xf32>
    %2 = vector.shape_cast %1 : vector<1x256xf32> to vector<1x1x256xf32>
    %cst_2 = arith.constant 4.000000e+00 : f32
    %3 = vector.broadcast %cst_2 : f32 to vector<1x1x256xf32>
    %4 = arith.divf %2, %3 : vector<1x1x256xf32>
    %5 = vector.broadcast %4 : vector<1x1x256xf32> to vector<1x4x256xf32>
    %6 = arith.subf %0, %5 : vector<1x4x256xf32>
    %c0_3 = arith.constant 0 : index
    %c0_4 = arith.constant 0 : index
    %c0_5 = arith.constant 0 : index
    %7 = vector.load %arg3[%c0_3, %c0_4, %c0_5] : memref<1x4x256xf32, #tpu.memory_space<vmem>>, vector<1x4x256xf32>
    tpu.vector_store %arg3[%c0_3, %c0_4, %c0_5], %6 {strides = array<i32>} : memref<1x4x256xf32, #tpu.memory_space<vmem>>, vector<1x4x256xf32>,
    return
  }
  func.func @transform_0(%arg0: i32, %arg1: i32) -> (i32, i32, i32) {
    %c0_i32 = arith.constant 0 : i32
    %c0_i32_0 = arith.constant 0 : i32
    return %arg0, %c0_i32, %arg1 : i32, i32, i32
  }
  func.func @transform_1(%arg0: i32, %arg1: i32) -> (i32, i32, i32) {
    %c0_i32 = arith.constant 0 : i32
    %c0_i32_0 = arith.constant 0 : i32
    return %arg0, %c0_i32, %arg1 : i32, i32, i32
  }
}

</mosaic_0001>

<bundles_post_ra>
// kernel: _my_bn_1_impl.1
= control target key start
LH: loop header
LB: loop body
LE: loop exit
PB: predicated region body
PF: predicated region fallthrough
CT: control target
= control target key end

     0   :  { %s343_s6 = smov 0   ;;  %s345_s7 = smov 0   ;;  %s376_s0 = inlined_call_operand.vmem [shape: f32[2,4,256], index: 0, kind: input, shape index: {}]   ;;  %s377_s1 = inlined_call_operand.vmem [shape: f32[2,4,256], index: 1, kind: output, shape index: {}]  }
   0x1   :  { %s347_s8 = smov 0  }
   0x2 LB: > { %s23_s9 = sadd.s32 1, %s327_s7  ;;  %p275_p0 = scmp.ge.s32.totalorder %s331_s8, 1  ;;  %s331_s8 = sphi %s347_s8, %s11_s8   ;;  %s327_s7 = sphi %s345_s7, %s379_s7   ;;  %s323_s6 = sphi %s343_s6, %s378_s6  }
   0x3   : > { %p25_p1 = scmp.ge.s32.totalorder %s23_s9, 2  ;;  %p108_p2 = scmp.lt.s32.totalorder %s331_s8, 3 }
   0x5   : > { %s381_s9 = smov (%p25_p1, %s23_s9), 0  ;;  %p109_p3 = pnand %p275_p0, %p108_p2 }
   0x6   : > { %p137_p4 = scmp.lt.s32.totalorder (!%p109_p3), %s323_s6, 1 }
   0x7   : > { %112 = sbr.rel (%p109_p3) target bundleno = 38 (0x26), region = 24 }
   0xc   : > { %s383_s6 = smov (!%p137_p4, %s323_s6), 1  ;;  %vm160_vm0 = vcmask 1043456  }
   0xd   : > { %s282_s10 = sshll.u32 %s383_s6, 3 }
   0xe   : > { %s144_s13 = scalar_lea.vmem %s376_s0, %s282_s10  ;;  %s154_s16 = scalar_lea.vmem %s377_s1, %s282_s10 }
   0xf   : > { %v156_v0 = vld [vmem:[%s144_s13] sm:$0xff] }
  0x10   : > { %v158_v1 = vcombine.high %v156_v0, %v156_v0  ;;  %v161_v2 = vsel %vm160_vm0, %v156_v0, 0.0 }
  0x11   : > { %v162_v3 = vrot.slane %v161_v2, 4 }
  0x12   : > { %v168_v4 = vsel %vm160_vm0, %v158_v1, 0.0 }
  0x13   : > { %v163_v5 = vadd.f32 %v162_v3, %v161_v2  ;;  %v169_v6 = vrot.slane %v168_v4, 4 }
  0x15   : > { %v164_v7 = vrot.slane %v163_v5, 2  ;;  %v170_v8 = vadd.f32 %v169_v6, %v168_v4 }
  0x17   : > { %v165_v9 = vadd.f32 %v164_v7, %v163_v5  ;;  %v171_v10 = vrot.slane %v170_v8, 2 }
  0x19   : > { %v166_v11 = vrot.slane %v165_v9, 1  ;;  %v172_v12 = vadd.f32 %v171_v10, %v170_v8 }
  0x1b   : > { %v167_v13 = vadd.f32 %v166_v11, %v165_v9  ;;  %v173_v14 = vrot.slane %v172_v12, 1 }
  0x1d   : > { %v174_v15 = vadd.f32 %v173_v14, %v172_v12  ;;  %v176_v16 = vmul.f32 0.25, %v167_v13 }
  0x1f   : > { %v177_v17 = vmul.f32 0.25, %v174_v15 }
  0x21   : > { %v180_v18 = vcombine.low %v176_v16, %v177_v17 }
  0x23   : > { %v182_v19 = vsub.f32 %v156_v0, %v180_v18 }
  0x25   : > { %183 = vst [vmem:[%s154_s16] sm:$0xff] %v182_v19 }
  0x26 PF: > { %s11_s8 = sadd.s32 1, %s331_s8   ;;  %s378_s6 = smov %s327_s7 }
  0x27   : > { %p8_p5 = scmp.ge.s32.totalorder %s11_s8, 4   ;;  %s379_s7 = smov %s381_s9 }
  0x29   :  { %10 = sbr.rel (!%p8_p5) target bundleno = 2 (0x2), region = 54 }

</bundles_post_ra>
